<compile_context>
chip_gen: v5e
topology: v5e:2x2
jax: 0.10.0
libtpu: 0.0.40
codegen_flags: <defaults>
</compile_context>

<pallas_src>
import jax
import jax.numpy as jnp
import numpy as np
from jax.experimental import pallas as pl
from jax.experimental.pallas import tpu as pltpu


def _cdiv(a, b):
    return -(-a // b)


def _round_up(x, m):
    return ((x + m - 1) // m) * m


def sudoku_mlp_kernel(tgt_ref, yhat_ref, w1e_ref, b1_ref, w2_ref, b2_ref,
                      out_ref, best_ref, match_ref):
    # Grid = (batch_blocks, num_classes); the class axis is the inner reduction axis.
    #   tgt_ref  : (TB, 648) int32  target digit repeated S times per cell (resident per block)
    #   yhat_ref : (TB, 648) f32/bf16  logits of class `c` for every (cell, step) lane
    #   w1e_ref  : (648, HID_P) f32  first-layer weights with atn_over_steps folded in
    #   out_ref  : (TB, NOUT_P) f32
    #   best_ref / match_ref : (TB, 648) running max / running (argmax == target) as float
    c = pl.program_id(1)
    v = yhat_ref[...]
    tgt_is_c = (tgt_ref[...] == c).astype(jnp.float32)

    @pl.when(c == 0)
    def _init():
        best_ref[...] = v
        match_ref[...] = tgt_is_c

    @pl.when(c > 0)
    def _update():
        gt = v > best_ref[...]            # strict '>' keeps argmax first-occurrence tie semantics
        best_ref[...] = jnp.where(gt, v, best_ref[...])
        match_ref[...] = jnp.where(gt, tgt_is_c, match_ref[...])

    @pl.when(c == pl.num_programs(1) - 1)
    def _finalize():
        # match @ W1e == ((argmax == target) * atn).sum(steps) @ W1   (atn folded into W1e)
        h = jnp.dot(match_ref[...], w1e_ref[...], preferred_element_type=jnp.float32)
        h = jnp.maximum(h + b1_ref[...], 0.0)
        out_ref[...] = jnp.dot(h, w2_ref[...], preferred_element_type=jnp.float32) + b2_ref[...]


def sudoku_mlp_forward(y_hat, target, atn, w1, b1, w2, b2, *, block_b=1024):
    """SudokuMLPNet forward (latent_sudoku_input_prob=False branch).

    y_hat : (B, C, 81, S) float;  target: (B, 81) int;  atn: (1, 1, S) float
    w1: (81, H); b1: (H,); w2: (H, N); b2: (N,)  (weights stored input-major)
    Returns latent_z: (B, N) float32.
    """
    B, C, CELLS, S = y_hat.shape
    HID = w1.shape[1]
    NOUT = w2.shape[1]
    CS = CELLS * S
    LANE = 128
    HID_P = _round_up(max(HID, LANE), LANE)
    NOUT_P = _round_up(max(NOUT, LANE), LANE)

    # ---- zero-copy views of the big input (no transpose, no pad) -------------------------
    if y_hat.dtype not in (jnp.float32, jnp.bfloat16):
        y_hat = y_hat.astype(jnp.float32)
    yh = jnp.reshape(y_hat, (B, C, 1, CS))          # free reshape; cells*steps on the lane axis

    # target expanded to one entry per (cell, step) lane (tiny vs. the y_hat stream)
    tgt = jnp.repeat(target.astype(jnp.int32), S, axis=1)                        # (B, 648)

    # Fold atn_over_steps + the sum-over-steps into the first linear layer.
    atn_vec = jnp.reshape(atn, (S,)).astype(jnp.float32)
    w1e = (w1.astype(jnp.float32)[:, None, :] * atn_vec[None, :, None]).reshape(CS, HID)

    # Lane-dense zero-padded MLP params (unmasked MXU matmuls / output stores).
    w1p = jnp.zeros((CS, HID_P), jnp.float32).at[:, :HID].set(w1e)
    b1p = jnp.zeros((1, HID_P), jnp.float32).at[:, :HID].set(
        jnp.reshape(b1, (1, HID)).astype(jnp.float32))
    w2p = jnp.zeros((HID_P, NOUT_P), jnp.float32).at[:HID, :NOUT].set(w2.astype(jnp.float32))
    b2p = jnp.zeros((1, NOUT_P), jnp.float32).at[:, :NOUT].set(
        jnp.reshape(b2, (1, NOUT)).astype(jnp.float32))

    # ---- batch blocking -------------------------------------------------------------------
    TB = min(block_b, B)
    if TB >= 8:
        TB = (TB // 8) * 8
    nb = _cdiv(B, TB)
    # Prefer an even number of batch blocks so the "parallel" axis splits evenly across
    # v7x's two TensorCores (no effect on single-TC v5e / v6e).
    if nb > 1 and nb % 2 == 1:
        tb2 = max(8, _round_up(_cdiv(B, nb + 1), 8))
        if _cdiv(B, tb2) % 2 == 0:
            TB = tb2
            nb = _cdiv(B, TB)

    # ---- VMEM budget: double-buffered streams + accumulator scratch, with headroom --------
    lane_pad = _round_up(CS, LANE)
    itm = yh.dtype.itemsize
    vmem_est = (2 * TB * lane_pad * itm             # y_hat class slabs (double buffered)
                + 2 * TB * lane_pad * 4             # expanded target (int32)
                + TB * lane_pad * (itm + 4)         # best / match scratch
                + 2 * TB * NOUT_P * 4               # output
                + 2 * (CS * HID_P + HID_P * NOUT_P + HID_P + NOUT_P) * 4)   # params
    vmem_limit = int(min(40 * 1024 * 1024, vmem_est + 12 * 1024 * 1024))

    out = pl.pallas_call(
        sudoku_mlp_kernel,
        grid=(nb, C),
        in_specs=[
            pl.BlockSpec((TB, CS), lambda i, c: (i, 0)),                     # target (resident per i)
            pl.BlockSpec((TB, None, None, CS), lambda i, c: (i, c, 0, 0)),   # y_hat class slab
            pl.BlockSpec((CS, HID_P), lambda i, c: (0, 0)),                  # w1e (resident)
            pl.BlockSpec((1, HID_P), lambda i, c: (0, 0)),                   # b1
            pl.BlockSpec((HID_P, NOUT_P), lambda i, c: (0, 0)),              # w2
            pl.BlockSpec((1, NOUT_P), lambda i, c: (0, 0)),                  # b2
        ],
        out_specs=pl.BlockSpec((TB, NOUT_P), lambda i, c: (i, 0)),
        out_shape=jax.ShapeDtypeStruct((B, NOUT_P), jnp.float32),
        scratch_shapes=[
            pltpu.VMEM((TB, CS), yh.dtype),        # running max over classes
            pltpu.VMEM((TB, CS), jnp.float32),     # running (argmax == target) as float
        ],
        compiler_params=pltpu.CompilerParams(
            dimension_semantics=("parallel", "arbitrary"),
            vmem_limit_bytes=vmem_limit,
        ),
    )(tgt, yh, w1p, b1p, w2p, b2p)

    return out[:, :NOUT]


if __name__ == "__main__":
    # small, forward-consistent shapes
    B, C, CELLS, S = 2, 9, 81, 8        # batch, classes, sudoku cells, sudoku_num_steps
    HID, NOUT = 32, 4                   # hidden dim (fixed 32), nlm_nullary_dim

    key = jax.random.PRNGKey(0)
    k = jax.random.split(key, 6)
    y_hat = jax.random.normal(k[0], (B, C, CELLS, S), jnp.float32)
    target = jax.random.randint(k[1], (B, CELLS), 0, C, jnp.int32)

    # parameters (PyTorch-Linear-style uniform init; weights stored (in, out))
    atn = jnp.ones((1, 1, S), jnp.float32)                 # nn.Parameter(torch.ones(1,1,S))
    lim1 = 1.0 / np.sqrt(CELLS)
    w1 = jax.random.uniform(k[2], (CELLS, HID), jnp.float32, -lim1, lim1)
    b1 = jax.random.uniform(k[3], (HID,), jnp.float32, -lim1, lim1)
    lim2 = 1.0 / np.sqrt(HID)
    w2 = jax.random.uniform(k[4], (HID, NOUT), jnp.float32, -lim2, lim2)
    b2 = jax.random.uniform(k[5], (NOUT,), jnp.float32, -lim2, lim2)

    latent_z = sudoku_mlp_forward(y_hat, target, atn, w1, b1, w2, b2)
    jax.block_until_ready(latent_z)

    # pure-JAX reference check (original layout / math)
    x_ref = (jnp.argmax(y_hat, axis=1) == target[:, :, None]).astype(jnp.float32)
    xs_ref = jnp.sum(x_ref * atn, axis=2)
    h_ref = jnp.maximum(xs_ref @ w1 + b1, 0.0)
    z_ref = h_ref @ w2 + b2
    assert np.allclose(np.asarray(latent_z), np.asarray(z_ref), atol=1e-5, rtol=1e-5)

    print("KERNEL_OK")
</pallas_src>

<mosaic_0001>
module attributes {stable_mosaic.version = 11 : i64} {
  func.func @sudoku_mlp_kernel(%arg0: i32, %arg1: i32, %arg2: memref<2x648xi32, #tpu.memory_space<vmem>>, %arg3: memref<2x1x1x648xf32, #tpu.memory_space<vmem>>, %arg4: memref<648x128xf32, #tpu.memory_space<vmem>>, %arg5: memref<1x128xf32, #tpu.memory_space<vmem>>, %arg6: memref<128x128xf32, #tpu.memory_space<vmem>>, %arg7: memref<1x128xf32, #tpu.memory_space<vmem>>, %arg8: memref<2x128xf32, #tpu.memory_space<vmem>>, %arg9: memref<2x648xf32, #tpu.memory_space<vmem>>, %arg10: memref<2x648xf32, #tpu.memory_space<vmem>>) attributes {dimension_semantics = [#tpu.dimension_semantics<parallel>, #tpu.dimension_semantics<arbitrary>], iteration_bounds = array<i64: 1, 9>, scalar_prefetch = 0 : i64, scratch_operands = 2 : i64, tpu.core_type = #tpu.core_type<tc>, window_params = [{transform_indices = @transform_0, window_bounds = array<i64: 2, 648>}, {transform_indices = @transform_1, window_bounds = array<i64: 2, 1, 1, 648>}, {pipeline_mode = #tpu.pipeline_mode<synchronous>, transform_indices = @transform_2, window_bounds = array<i64: 648, 128>}, {pipeline_mode = #tpu.pipeline_mode<synchronous>, transform_indices = @transform_3, window_bounds = array<i64: 1, 128>}, {pipeline_mode = #tpu.pipeline_mode<synchronous>, transform_indices = @transform_4, window_bounds = array<i64: 128, 128>}, {pipeline_mode = #tpu.pipeline_mode<synchronous>, transform_indices = @transform_5, window_bounds = array<i64: 1, 128>}, {transform_indices = @transform_6, window_bounds = array<i64: 2, 128>}]} {
    %c0 = arith.constant 0 : index
    %c0_0 = arith.constant 0 : index
    %c0_1 = arith.constant 0 : index
    %c0_2 = arith.constant 0 : index
    %0 = vector.load %arg3[%c0, %c0_0, %c0_1, %c0_2] : memref<2x1x1x648xf32, #tpu.memory_space<vmem>>, vector<2x1x1x648xf32>
    %1 = vector.shape_cast %0 : vector<2x1x1x648xf32> to vector<2x648xf32>
    %c0_3 = arith.constant 0 : index
    %c0_4 = arith.constant 0 : index
    %2 = vector.load %arg2[%c0_3, %c0_4] : memref<2x648xi32, #tpu.memory_space<vmem>>, vector<2x648xi32>
    %3 = vector.broadcast %arg1 : i32 to vector<2x648xi32>
    %4 = arith.cmpi eq, %2, %3 : vector<2x648xi32>
    %5 = arith.extui %4 : vector<2x648xi1> to vector<2x648xi32>
    %6 = arith.sitofp %5 : vector<2x648xi32> to vector<2x648xf32>
    %c0_i32 = arith.constant 0 : i32
    %7 = arith.cmpi eq, %arg1, %c0_i32 : i32
    %8 = arith.extui %7 : i1 to i32
    %c0_i32_5 = arith.constant 0 : i32
    %9 = arith.cmpi ne, %8, %c0_i32_5 : i32
    scf.if %9 {
      %c0_9 = arith.constant 0 : index
      %c0_10 = arith.constant 0 : index
      %16 = vector.load %arg9[%c0_9, %c0_10] : memref<2x648xf32, #tpu.memory_space<vmem>>, vector<2x648xf32>
      tpu.vector_store %arg9[%c0_9, %c0_10], %1 {strides = array<i32>} : memref<2x648xf32, #tpu.memory_space<vmem>>, vector<2x648xf32>,
      %c0_11 = arith.constant 0 : index
      %c0_12 = arith.constant 0 : index
      %17 = vector.load %arg10[%c0_11, %c0_12] : memref<2x648xf32, #tpu.memory_space<vmem>>, vector<2x648xf32>
      tpu.vector_store %arg10[%c0_11, %c0_12], %6 {strides = array<i32>} : memref<2x648xf32, #tpu.memory_space<vmem>>, vector<2x648xf32>,
    } else {
    }
    %c0_i32_6 = arith.constant 0 : i32
    %10 = arith.cmpi sgt, %arg1, %c0_i32_6 : i32
    %11 = arith.extui %10 : i1 to i32
    %c0_i32_7 = arith.constant 0 : i32
    %12 = arith.cmpi ne, %11, %c0_i32_7 : i32
    scf.if %12 {
      %c0_9 = arith.constant 0 : index
      %c0_10 = arith.constant 0 : index
      %16 = vector.load %arg9[%c0_9, %c0_10] : memref<2x648xf32, #tpu.memory_space<vmem>>, vector<2x648xf32>
      %17 = arith.cmpf ogt, %1, %16 : vector<2x648xf32>
      %c0_11 = arith.constant 0 : index
      %c0_12 = arith.constant 0 : index
      %18 = vector.load %arg9[%c0_11, %c0_12] : memref<2x648xf32, #tpu.memory_space<vmem>>, vector<2x648xf32>
      %19 = arith.select %17, %1, %18 : vector<2x648xi1>, vector<2x648xf32>
      %c0_13 = arith.constant 0 : index
      %c0_14 = arith.constant 0 : index
      %20 = vector.load %arg9[%c0_13, %c0_14] : memref<2x648xf32, #tpu.memory_space<vmem>>, vector<2x648xf32>
      tpu.vector_store %arg9[%c0_13, %c0_14], %19 {strides = array<i32>} : memref<2x648xf32, #tpu.memory_space<vmem>>, vector<2x648xf32>,
      %c0_15 = arith.constant 0 : index
      %c0_16 = arith.constant 0 : index
      %21 = vector.load %arg10[%c0_15, %c0_16] : memref<2x648xf32, #tpu.memory_space<vmem>>, vector<2x648xf32>
      %22 = arith.select %17, %6, %21 : vector<2x648xi1>, vector<2x648xf32>
      %c0_17 = arith.constant 0 : index
      %c0_18 = arith.constant 0 : index
      %23 = vector.load %arg10[%c0_17, %c0_18] : memref<2x648xf32, #tpu.memory_space<vmem>>, vector<2x648xf32>
      tpu.vector_store %arg10[%c0_17, %c0_18], %22 {strides = array<i32>} : memref<2x648xf32, #tpu.memory_space<vmem>>, vector<2x648xf32>,
    } else {
    }
    %c8_i32 = arith.constant 8 : i32
    %13 = arith.cmpi eq, %arg1, %c8_i32 : i32
    %14 = arith.extui %13 : i1 to i32
    %c0_i32_8 = arith.constant 0 : i32
    %15 = arith.cmpi ne, %14, %c0_i32_8 : i32
    scf.if %15 {
      %c0_9 = arith.constant 0 : index
      %c0_10 = arith.constant 0 : index
      %16 = vector.load %arg10[%c0_9, %c0_10] : memref<2x648xf32, #tpu.memory_space<vmem>>, vector<2x648xf32>
      %c0_11 = arith.constant 0 : index
      %c0_12 = arith.constant 0 : index
      %17 = vector.load %arg4[%c0_11, %c0_12] : memref<648x128xf32, #tpu.memory_space<vmem>>, vector<648x128xf32>
      %cst = arith.constant dense<0.000000e+00> : vector<2x128xf32>
      %18 = tpu.matmul %16, %17, %cst {dimension_numbers = #tpu.dot_dimension_numbers<[1], [0], [0], [1], [0, 0, 1, 1], [], []>} : vector<2x648xf32>, vector<648x128xf32>, vector<2x128xf32> -> vector<2x128xf32>
      %c0_13 = arith.constant 0 : index
      %c0_14 = arith.constant 0 : index
      %19 = vector.load %arg5[%c0_13, %c0_14] : memref<1x128xf32, #tpu.memory_space<vmem>>, vector<1x128xf32>
      %20 = vector.broadcast %19 : vector<1x128xf32> to vector<2x128xf32>
      %21 = arith.addf %18, %20 : vector<2x128xf32>
      %cst_15 = arith.constant 0.000000e+00 : f32
      %22 = vector.broadcast %cst_15 : f32 to vector<2x128xf32>
      %23 = arith.maximumf %21, %22 : vector<2x128xf32>
      %c0_16 = arith.constant 0 : index
      %c0_17 = arith.constant 0 : index
      %24 = vector.load %arg6[%c0_16, %c0_17] : memref<128x128xf32, #tpu.memory_space<vmem>>, vector<128x128xf32>
      %cst_18 = arith.constant dense<0.000000e+00> : vector<2x128xf32>
      %25 = tpu.matmul %23, %24, %cst_18 {dimension_numbers = #tpu.dot_dimension_numbers<[1], [0], [0], [1], [0, 0, 1, 1], [], []>} : vector<2x128xf32>, vector<128x128xf32>, vector<2x128xf32> -> vector<2x128xf32>
      %c0_19 = arith.constant 0 : index
      %c0_20 = arith.constant 0 : index
      %26 = vector.load %arg7[%c0_19, %c0_20] : memref<1x128xf32, #tpu.memory_space<vmem>>, vector<1x128xf32>
      %27 = vector.broadcast %26 : vector<1x128xf32> to vector<2x128xf32>
      %28 = arith.addf %25, %27 : vector<2x128xf32>
      %c0_21 = arith.constant 0 : index
      %c0_22 = arith.constant 0 : index
      %29 = vector.load %arg8[%c0_21, %c0_22] : memref<2x128xf32, #tpu.memory_space<vmem>>, vector<2x128xf32>
      tpu.vector_store %arg8[%c0_21, %c0_22], %28 {strides = array<i32>} : memref<2x128xf32, #tpu.memory_space<vmem>>, vector<2x128xf32>,
    } else {
    }
    return
  }
  func.func @transform_0(%arg0: i32, %arg1: i32) -> (i32, i32) {
    %c0_i32 = arith.constant 0 : i32
    %c0_i32_0 = arith.constant 0 : i32
    return %arg0, %c0_i32 : i32, i32
  }
  func.func @transform_1(%arg0: i32, %arg1: i32) -> (i32, i32, i32, i32) {
    %c0_i32 = arith.constant 0 : i32
    %c0_i32_0 = arith.constant 0 : i32
    %c0_i32_1 = arith.constant 0 : i32
    return %arg0, %arg1, %c0_i32, %c0_i32_0 : i32, i32, i32, i32
  }
  func.func @transform_2(%arg0: i32, %arg1: i32) -> (i32, i32) {
    %c0_i32 = arith.constant 0 : i32
    %c0_i32_0 = arith.constant 0 : i32
    %c0_i32_1 = arith.constant 0 : i32
    return %c0_i32, %c0_i32_0 : i32, i32
  }
  func.func @transform_3(%arg0: i32, %arg1: i32) -> (i32, i32) {
    %c0_i32 = arith.constant 0 : i32
    %c0_i32_0 = arith.constant 0 : i32
    %c0_i32_1 = arith.constant 0 : i32
    return %c0_i32, %c0_i32_0 : i32, i32
  }
  func.func @transform_4(%arg0: i32, %arg1: i32) -> (i32, i32) {
    %c0_i32 = arith.constant 0 : i32
    %c0_i32_0 = arith.constant 0 : i32
    %c0_i32_1 = arith.constant 0 : i32
    return %c0_i32, %c0_i32_0 : i32, i32
  }
  func.func @transform_5(%arg0: i32, %arg1: i32) -> (i32, i32) {
    %c0_i32 = arith.constant 0 : i32
    %c0_i32_0 = arith.constant 0 : i32
    %c0_i32_1 = arith.constant 0 : i32
    return %c0_i32, %c0_i32_0 : i32, i32
  }
  func.func @transform_6(%arg0: i32, %arg1: i32) -> (i32, i32) {
    %c0_i32 = arith.constant 0 : i32
    %c0_i32_0 = arith.constant 0 : i32
    return %arg0, %c0_i32 : i32, i32
  }
}

</mosaic_0001>

<bundles_post_ra>
// kernel: tpu_custom_call.1
= control target key start
LH: loop header
LB: loop body
LE: loop exit
PB: predicated region body
PF: predicated region fallthrough
CT: control target
= control target key end

     0   :  { %s1500_s0 = inlined_call_operand.hbm [shape: s32[2,648], index: 0, kind: input, shape index: {}]   ;;  %s1501_s1 = inlined_call_operand.hbm [shape: f32[2,9,1,648], index: 1, kind: input, shape index: {}]   ;;  %s1502_s2 = inlined_call_operand.hbm [shape: f32[648,128], index: 2, kind: input, shape index: {}]   ;;  %s1503_s3 = inlined_call_operand.vmem [shape: f32[1,128], index: 3, kind: input, shape index: {}]   ;;  %s1504_s4 = inlined_call_operand.hbm [shape: f32[128,128], index: 4, kind: input, shape index: {}]   ;;  %s1505_s5 = inlined_call_operand.vmem [shape: f32[1,128], index: 5, kind: input, shape index: {}]   ;;  %s1506_s6 = inlined_call_operand.hbm [shape: f32[2,128], index: 6, kind: output, shape index: {}]  }
   0x1   :  { %1507 = sst [smem:[#allocation18_spill]] %s1500_s0 }
   0x2   :  { %1508 = sst [smem:[#allocation19_spill]] %s1502_s2 }
   0x3   :  { %1509 = sst [smem:[#allocation20_spill]] %s1504_s4 }
   0x4   :  { %11 = vsyncpa [#allocation5], 0 }
   0x5   :  { %12 = vsyncpa [#allocation8], 0 }
   0x6   :  { %14 = vsyncpa [#allocation8 + $0x1], 0 }
   0x7   :  { %15 = vsyncpa [#allocation11], 0 }
   0x8   :  { %16 = vsyncpa [#allocation6], 0  ;;  %s1263_s21 = smov 0   ;;  %s1265_s22 = smov 0  }
   0x9   :  { %s1267_s23 = smov 0   ;;  %s1269_s24 = smov 0  }
   0xa   :  { %s1271_s25 = smov 0   ;;  %s1273_s26 = smov 0  }
   0xb LB: > { %s1292_s27 = sadd.s32 4294967295, %s1216_s26   ;;  %p76_p0 = scmp.ne.s32.totalorder %s1204_s23, %s1200_s22  ;;  %s1216_s26 = sphi %s1273_s26, %s22_s26   ;;  %s1212_s25 = sphi %s1271_s25, %s1524_s25   ;;  %s1208_s24 = sphi %s1269_s24, %s1523_s24   ;;  %s1204_s23 = sphi %s1267_s23, %s1522_s23   ;;  %s1200_s22 = sphi %s1265_s22, %s1521_s22   ;;  %s1196_s21 = sphi %s1263_s21, %s1520_s21  }
   0xc   : > { %p77_p1 = scmp.eq.s32.totalorder %s1216_s26, 0  ;;  %p82_p2 = scmp.ne.s32.totalorder %s1200_s22, %s1196_s21 }
   0xd   : > { %p83_p3 = scmp.eq.s32.totalorder %s1292_s27, 0  ;;  %p879_p4 = scmp.ge.s32.totalorder %s1216_s26, 1 }
   0xe   : > { %p1300_p5 = por %p77_p1, %p76_p0  ;;  %p203_p6 = scmp.lt.s32.totalorder %s1216_s26, 10 }
   0xf   : > { %p1307_p7 = por %p83_p3, %p82_p2  ;;  %s1513_s2 = sld [smem:[#allocation19_spill]] }
  0x10   : > { %p1311_p8 = pnand %p879_p4, %p203_p6  ;;  %s1218_s10 = smov [#allocation9]  }
  0x11   : > { %s231_s11 = sshll.u32 %s1218_s10, 4  ;;  %p936_p11 = scmp.lt.s32.totalorder %s1216_s26, 9  ;;  %s232_s11 = int_to_ptr.vmem [resolvable:$true] %s231_s11 }
  0x12   : > { %p919_p9 = pneg %p1311_p8  ;;  %s1219_s13 = smov 128  }
  0x13   : > { %s1220_s14 = smov 8   ;;  %p1331_p12 = pnand %p936_p11, %p1300_p5 }
  0x14   : > { %p1322_p10 = pnand %p919_p9, %p83_p3  ;;  %s1516_s0 = sld [smem:[#allocation18_spill]] }
  0x15   : > { %s229_s9 = sshll.u32 %s1513_s2, 4  ;;  %s1221_s19 = smov [#allocation4]   ;;  %s230_s9 = int_to_ptr.hbm [resolvable:$true] %s229_s9 }
  0x16   : > { %925 = dma.hbm_to_vmem [thread:$0]  (!%p1322_p10), %s230_s9, 10368, %s232_s11, [#allocation8], %s1219_s13, %s1219_s13, %s1220_s14  }
  0x17   : > { %s220_s20 = sshll.u32 %s1221_s19, 4  ;;  %s1517_s4 = sld [smem:[#allocation20_spill]]  ;;  %s221_s20 = int_to_ptr.vmem [resolvable:$true] %s220_s20 }
  0x18   : > { %s1222_s28 = smov [#allocation10]   ;;  %s31_s10 = sadd.s32 1, %s1212_s25 }
  0x19   : > { %s248_s9 = sshll.u32 %s1222_s28, 4  ;;  %p32_p13 = scmp.ge.s32.totalorder %s31_s10, 9  ;;  %s249_s9 = int_to_ptr.vmem [resolvable:$true] %s248_s9 }
  0x1a   : > { %s218_s18 = sshll.u32 %s1516_s0, 4  ;;  %s69_s11 = sadd.s32 1, %s1204_s23  ;;  %s219_s18 = int_to_ptr.hbm [resolvable:$true] %s218_s18 }
  0x1b   : > { %922 = dma.hbm_to_vmem [thread:$0]  (!%p1322_p10), %s219_s18, 192, %s221_s20, [#allocation5]  }
  0x1c   : > { %s265_s16 = sand.u32 1, %s1216_s26   ;;  %s267_s17 = sand.u32 1, %s1204_s23  }
  0x1d   : > { %s246_s8 = sshll.u32 %s1517_s4, 4  ;;  %s1526_s10 = smov (%p32_p13, %s31_s10), 0  ;;  %s247_s8 = int_to_ptr.hbm [resolvable:$true] %s246_s8 }
  0x1e   : > { %928 = dma.hbm_to_vmem [thread:$0]  (!%p1322_p10), %s247_s8, 2048, %s249_s9, [#allocation11], %s1219_s13, %s1219_s13, %s1220_s14  }
  0x1f   : > { %s898_s19 = smul.u32 12, %s267_s17  ;;  %s65_s21 = ssub.s32 %s1212_s25, %s1526_s10 }
  0x20   : > { %s899_s7 = smul.u32 6, %s1212_s25  ;;  %p67_p0 = scmp.eq.s32.totalorder %s65_s21, 0 }
  0x21   : > { %s269_s0 = scalar_lea.vmem [#allocation7], %s898_s19  ;;  %s266_s14 = scalar_lea.sflag [#allocation8], %s265_s16 }
  0x22   : > { %s276_s28 = scalar_lea.hbm %s1501_s1, %s899_s7  ;;  %s279_s2 = sshll.u32 %s269_s0, 4  ;;  %s280_s2 = int_to_ptr.vmem [resolvable:$true] %s279_s2 }
  0x23   : > { %s1358_s12 = scalar_select %p67_p0, %s1204_s23, %s69_s11  }
  0x24   : > { %s277_s13 = sshll.u32 %s276_s28, 4  ;;  %s1223_s8 = smov 864   ;;  %s278_s13 = int_to_ptr.hbm [resolvable:$true] %s277_s13 }
  0x25   : > { %s1224_s9 = smov 96   ;;  %s1225_s4 = smov 6  }
  0x26   : > { %932 = dma.hbm_to_vmem [thread:$0]  (!%p1331_p12), %s278_s13, 192, %s280_s2, %s266_s14, %s1223_s8, %s1224_s9, %s1225_s4  }
  0x27   : > { %291 = sbr.rel (%p1311_p8) target bundleno = 465 (0x1d1), region = 44 }
  0x2c   : > { %1175 = dma.done.wait (%p83_p3), [#allocation5], 192  }
  0x2d   : > { %1177 = vsyncadd (%p83_p3), [#allocation5], 4294967104  ;;  %s298_s0 = sand.u32 1, %s1292_s27   ;;  %s300_s11 = sand.u32 1, %s1200_s22  }
  0x2e   : > { %s900_s16 = smul.u32 12, %s300_s11  ;;  %s299_s17 = scalar_lea.sflag [#allocation8], %s298_s0 }
  0x30   : > { %s302_s19 = scalar_lea.vmem [#allocation7], %s900_s16 }
  0x31   : > { %1179 = dma.done.wait (%p1307_p7), %s299_s17, 192  }
  0x32   : > { %1181 = vsyncadd (%p1307_p7), %s299_s17, 4294967104 }
  0x33   : > { %1183 = dma.done.wait (%p83_p3), [#allocation8], 10368  }
  0x34   : > { %1185 = vsyncadd (%p83_p3), [#allocation8], 4294956928 }
  0x35   : > { %1187 = dma.done.wait (%p83_p3), [#allocation11], 2048  }
  0x36   : > { %1189 = vsyncadd (%p83_p3), [#allocation11], 4294965248  ;;  %v342_v0 = vstv %s1208_s24  ;;  %v1383_v1 = vld [vmem:[%s302_s19] sm:$0x3f]  ;;  %v1385_v2 = vld [vmem:[%s302_s19 + $0x6] sm:$0x3f] }
  0x37   : > { %v340_v3 = vld [vmem:[#allocation4] sm:$0xff]  ;;  %v341_v4 = vld [vmem:[#allocation4 + $0x8] sm:$0xf]  ;;  %v1226_v5 = vmov 0.0   ;;  %p890_p1 = scmp.ne.s32.totalorder %s1208_s24, 0 }
  0x38   : > { %vm343_vm0 = vcmp.eq.s32.totalorder %v340_v3, %v342_v0  ;;  %vm344_vm1 = vcmp.eq.s32.totalorder %v341_v4, %v342_v0 }
  0x39   : > { %v1387_v6 = vsel %vm343_vm0, 1.0, %v1226_v5  ;;  %v1389_v7 = vsel %vm344_vm1, 1.0, %v1226_v5  ;;  %352 = sbr.rel (%p890_p1) target bundleno = 73 (0x49), region = 64 }
  0x3e   : > { %355 = vst [vmem:[#allocation1] ss:$2 sm:$0xff] %v1383_v1  ;;  %vm363_vm2 = vcmask 1041408   ;;  %vm364_vm3 = vcmask 60418  }
  0x3f   : > { %357 = vst [vmem:[#allocation1 + $0x1] ss:$2 sm:$0xff] %v1385_v2  ;;  %vm365_vm4 = vmor %vm364_vm3, %vm363_vm2 }
  0x40   : > { %368 = vst.msk [vmem:[#allocation3 + $0x8] sm:$0xf] %vm365_vm4, %v1389_v7 }
  0x41   : > { %367 = vst [vmem:[#allocation3] sm:$0xff] %v1387_v6 }
  0x46   : > { %v358_v8 = vld [vmem:[#allocation1] sm:$0xff]  ;;  %v359_v9 = vld [vmem:[#allocation1 + $0x8] sm:$0xff] }
  0x47   : > { %362 = vst [vmem:[#allocation2] sm:$0xff] %v358_v8 }
  0x48   : > { %366 = vst.msk [vmem:[#allocation2 + $0x8] sm:$0xf] %vm365_vm4, %v359_v9 }
  0x49 PF: > { %p891_p2 = scmp.le.s32.totalorder %s1208_s24, 0 }
  0x4b   : > { %372 = sbr.rel (%p891_p2) target bundleno = 121 (0x79), region = 68 }
  0x50   : > { %v373_v10 = vld [vmem:[#allocation2] sm:$0xff]  ;;  %v374_v11 = vld [vmem:[#allocation2 + $0x8] sm:$0xf]  ;;  %vm384_vm5 = vcmask 1040384   ;;  %vm386_vm6 = vcmask 1042434   ;;  %vm388_vm7 = vcmask 1041408  }
  0x51   : > { %v377_v12 = vrot.slane %v373_v10, 1  ;;  %v378_v13 = vrot.slane %v373_v10, 2  ;;  %v379_v14 = vrot.slane %v373_v10, 3  ;;  %v380_v15 = vrot.slane %v374_v11, 4  ;;  %v432_v29 = vld [vmem:[#allocation3] sm:$0xff] }
  0x52   : > { %v381_v16 = vrot.slane %v374_v11, 5  ;;  %v382_v17 = vrot.slane %v374_v11, 6  ;;  %v383_v18 = vrot.slane %v374_v11, 7  ;;  %vm390_vm8 = vcmask 1044484   ;;  %v433_v33 = vld [vmem:[#allocation3 + $0x8] sm:$0xf] }
  0x53   : > { %v385_v19 = vsel %vm384_vm5, %v373_v10, %v377_v12  ;;  %v387_v20 = vsel %vm386_vm6, %v378_v13, %v379_v14  ;;  %vm392_vm9 = vcmask 1046534   ;;  %vm394_vm10 = vcmask 1045508  }
  0x54   : > { %v389_v21 = vsel %vm388_vm7, %v385_v19, %v387_v20  ;;  %v391_v22 = vsel %vm390_vm8, %v380_v15, %v381_v16  ;;  %v393_v23 = vsel %vm392_vm9, %v382_v17, %v383_v18  ;;  %vm396_vm11 = vcmask 1043456  }
  0x55   : > { %v395_v24 = vsel %vm394_vm10, %v391_v22, %v393_v23  ;;  %v436_v26 = vrot.slane %v1387_v6, 1  ;;  %v437_v27 = vrot.slane %v1387_v6, 2  ;;  %v438_v30 = vrot.slane %v1387_v6, 3 }
  0x56   : > { %v1404_v25 = vsel %vm396_vm11, %v389_v21, %v395_v24  ;;  %v439_v31 = vrot.slane %v1389_v7, 4  ;;  %v440_v32 = vrot.slane %v1389_v7, 5  ;;  %v441_v34 = vrot.slane %v1389_v7, 6 }
  0x57   : > { %vm415_vm12 = vcmp.gt.f32.partialorder %v1383_v1, %v1404_v25  ;;  %v442_v35 = vrot.slane %v1389_v7, 7  ;;  %v443_v36 = vsel %vm384_vm5, %v1387_v6, %v436_v26  ;;  %v444_v37 = vsel %vm386_vm6, %v437_v27, %v438_v30 }
  0x58   : > { %v417_v28 = vsel %vm415_vm12, %v1383_v1, %v1404_v25  ;;  %v446_v38 = vsel %vm390_vm8, %v439_v31, %v440_v32  ;;  %v462_v40 = vrot.slane %v432_v29, 1  ;;  %v463_v41 = vrot.slane %v432_v29, 2 }
  0x59   : > { %421 = vst [vmem:[#allocation1] ss:$2 sm:$0xff] %v417_v28  ;;  %v447_v39 = vsel %vm392_vm9, %v441_v34, %v442_v35  ;;  %vm398_vm13 = vcmask 1041409   ;;  %v464_v42 = vrot.slane %v432_v29, 3  ;;  %v465_v43 = vrot.slane %v433_v33, 4 }
  0x5a   : > { %v466_v44 = vrot.slane %v433_v33, 5  ;;  %v399_v45 = vsel %vm398_vm13, %v373_v10, %v377_v12  ;;  %v467_v46 = vrot.slane %v433_v33, 6  ;;  %vm400_vm14 = vcmask 1043459  }
  0x5b   : > { %vm402_vm15 = vcmask 1042433   ;;  %vm404_vm0 = vcmask 1045509   ;;  %v468_v47 = vrot.slane %v433_v33, 7  ;;  %v401_v48 = vsel %vm400_vm14, %v378_v13, %v379_v14 }
  0x5c   : > { %v405_v49 = vsel %vm404_vm0, %v380_v15, %v381_v16  ;;  %vm406_vm1 = vcmask 1046528   ;;  %v469_v50 = vsel %vm384_vm5, %v432_v29, %v462_v40  ;;  %v403_v51 = vsel %vm402_vm15, %v399_v45, %v401_v48 }
  0x5d   : > { %v407_v52 = vsel %vm406_vm1, %v383_v18, %v382_v17  ;;  %vm408_vm2 = vcmask 1046533   ;;  %vm410_vm3 = vcmask 1044481   ;;  %v450_v54 = vsel %vm398_vm13, %v1387_v6, %v436_v26 }
  0x5e   : > { %v409_v53 = vsel %vm408_vm2, %v405_v49, %v407_v52  ;;  %v451_v55 = vsel %vm400_vm14, %v437_v27, %v438_v30  ;;  %v470_v56 = vsel %vm386_vm6, %v463_v41, %v464_v42  ;;  %v453_v58 = vsel %vm404_vm0, %v439_v31, %v440_v32 }
  0x5f   : > { %v411_v57 = vsel %vm410_vm3, %v403_v51, %v409_v53  ;;  %v454_v59 = vsel %vm406_vm1, %v442_v35, %v441_v34  ;;  %v472_v60 = vsel %vm390_vm8, %v465_v43, %v466_v44  ;;  %v476_v62 = vsel %vm398_vm13, %v432_v29, %v462_v40 }
  0x60   : > { %v412_v61 = vrot.slane %v411_v57, 1  ;;  %v477_v63 = vsel %vm400_vm14, %v463_v41, %v464_v42  ;;  %v473_v0 = vsel %vm392_vm9, %v467_v46, %v468_v47  ;;  %v452_v3 = vsel %vm402_vm15, %v450_v54, %v451_v55 }
  0x61   : > { %v479_v4 = vsel %vm404_vm0, %v465_v43, %v466_v44  ;;  %v480_v5 = vsel %vm406_vm1, %v468_v47, %v467_v46  ;;  %v455_v7 = vsel %vm408_vm2, %v453_v58, %v454_v59  ;;  %v478_v8 = vsel %vm402_vm15, %v476_v62, %v477_v63 }
  0x62   : > { %vm1447_vm4 = vcmp.gt.f32.partialorder %v1385_v2, %v412_v61  ;;  %v481_v9 = vsel %vm408_vm2, %v479_v4, %v480_v5  ;;  %v445_v11 = vsel %vm388_vm7, %v443_v36, %v444_v37  ;;  %v448_v12 = vsel %vm394_vm10, %v446_v38, %v447_v39 }
  0x63   : > { %v418_v10 = vsel %vm1447_vm4, %v1385_v2, %v412_v61  ;;  %v471_v13 = vsel %vm388_vm7, %v469_v50, %v470_v56  ;;  %v474_v14 = vsel %vm394_vm10, %v472_v60, %v473_v0  ;;  %v456_v15 = vsel %vm410_vm3, %v452_v3, %v455_v7 }
  0x64   : > { %423 = vst [vmem:[#allocation1 + $0x1] ss:$2 sm:$0xff] %v418_v10  ;;  %v482_v16 = vsel %vm410_vm3, %v478_v8, %v481_v9  ;;  %vm429_vm5 = vcmask 60418   ;;  %v449_v17 = vsel %vm396_vm11, %v445_v11, %v448_v12  ;;  %v475_v18 = vsel %vm396_vm11, %v471_v13, %v474_v14 }
  0x65   : > { %v457_v19 = vrot.slane %v456_v15, 1  ;;  %v483_v2 = vrot.slane %v482_v16, 1  ;;  %vm430_vm6 = vmor %vm429_vm5, %vm388_vm7  ;;  %v486_v20 = vsel %vm415_vm12, %v449_v17, %v475_v18 }
  0x67   : > { %v487_v23 = vsel %vm1447_vm4, %v457_v19, %v483_v2 }
  0x6b   : > { %v424_v21 = vld [vmem:[#allocation1] sm:$0xff]  ;;  %v425_v22 = vld [vmem:[#allocation1 + $0x8] sm:$0xff] }
  0x6c   : > { %428 = vst [vmem:[#allocation2] sm:$0xff] %v424_v21 }
  0x6d   : > { %431 = vst.msk [vmem:[#allocation2 + $0x8] sm:$0xf] %vm430_vm6, %v425_v22 }
  0x6e   : > { %490 = vst [vmem:[#allocation1] ss:$2 sm:$0xff] %v486_v20 }
  0x6f   : > { %492 = vst [vmem:[#allocation1 + $0x1] ss:$2 sm:$0xff] %v487_v23 }
  0x76   : > { %v493_v24 = vld [vmem:[#allocation1] sm:$0xff]  ;;  %v494_v26 = vld [vmem:[#allocation1 + $0x8] sm:$0xff] }
  0x77   : > { %497 = vst [vmem:[#allocation3] sm:$0xff] %v493_v24 }
  0x78   : > { %498 = vst.msk [vmem:[#allocation3 + $0x8] sm:$0xf] %vm430_vm6, %v494_v26 }
  0x79 PF: > { %p892_p3 = scmp.ne.s32.totalorder %s1208_s24, 8 }
  0x7b   : > { %502 = sbr.rel (%p892_p3) target bundleno = 459 (0x1cb), region = 72 }
  0x80   : > { %v520_v27 = vld [vmem:[#allocation9 + $0x78] sm:$0xff]  ;;  %v519_v1 = vld [vmem:[#allocation9 + $0x70] sm:$0xff]  ;;  %v518_v25 = vld [vmem:[#allocation9 + $0x68] sm:$0xff]  ;;  %vm606_vm7 = vcmask 64512  }
  0x81   : > { %609 = vmatpush.msra.mxu0 %v520_v27  ;;  %v552_v28 = vld [vmem:[#allocation9 + $0x178] sm:$0xff]  ;;  %v517_v29 = vld [vmem:[#allocation9 + $0x60] sm:$0xff]  ;;  %v551_v30 = vld [vmem:[#allocation9 + $0x170] sm:$0xff] }
  0x82   : > { %649 = vmatpush.msra.mxu2 %v552_v28  ;;  %v568_v31 = vld [vmem:[#allocation9 + $0x1f8] sm:$0xff]  ;;  %v550_v33 = vld [vmem:[#allocation9 + $0x168] sm:$0xff]  ;;  %v567_v35 = vld [vmem:[#allocation9 + $0x1f0] sm:$0xff] }
  0x83   : > { %610 = vmatpush.msra.mxu0 %v519_v1  ;;  %669 = vmatpush.msra.mxu3 %v568_v31  ;;  %v536_v32 = vld [vmem:[#allocation9 + $0xf8] sm:$0xff]  ;;  %v535_v36 = vld [vmem:[#allocation9 + $0xf0] sm:$0xff]  ;;  %v549_v37 = vld [vmem:[#allocation9 + $0x160] sm:$0xff] }
  0x84   : > { %v516_v34 = vld [vmem:[#allocation9 + $0x58] sm:$0xff]  ;;  %650 = vmatpush.msra.mxu2 %v551_v30  ;;  %629 = vmatpush.msra.mxu1 %v536_v32  ;;  %v566_v38 = vld [vmem:[#allocation9 + $0x1e8] sm:$0xff]  ;;  %v515_v39 = vld [vmem:[#allocation9 + $0x50] sm:$0xff] }
  0x85   : > { %611 = vmatpush.msra.mxu0 %v518_v25  ;;  %670 = vmatpush.msra.mxu3 %v567_v35  ;;  %v534_v40 = vld [vmem:[#allocation9 + $0xe8] sm:$0xff]  ;;  %v565_v41 = vld [vmem:[#allocation9 + $0x1e0] sm:$0xff]  ;;  %v548_v42 = vld [vmem:[#allocation9 + $0x158] sm:$0xff] }
  0x86   : > { %651 = vmatpush.msra.mxu2 %v550_v33  ;;  %630 = vmatpush.msra.mxu1 %v535_v36  ;;  %v533_v43 = vld [vmem:[#allocation9 + $0xe0] sm:$0xff]  ;;  %v514_v44 = vld [vmem:[#allocation9 + $0x48] sm:$0xff]  ;;  %v564_v45 = vld [vmem:[#allocation9 + $0x1d8] sm:$0xff] }
  0x87   : > { %612 = vmatpush.msra.mxu0 %v517_v29  ;;  %671 = vmatpush.msra.mxu3 %v566_v38  ;;  %v547_v46 = vld [vmem:[#allocation9 + $0x150] sm:$0xff]  ;;  %v532_v47 = vld [vmem:[#allocation9 + $0xd8] sm:$0xff]  ;;  %v513_v48 = vld [vmem:[#allocation9 + $0x40] sm:$0xff] }
  0x88   : > { %652 = vmatpush.msra.mxu2 %v549_v37  ;;  %631 = vmatpush.msra.mxu1 %v534_v40  ;;  %v563_v49 = vld [vmem:[#allocation9 + $0x1d0] sm:$0xff]  ;;  %v546_v50 = vld [vmem:[#allocation9 + $0x148] sm:$0xff]  ;;  %v512_v52 = vld [vmem:[#allocation9 + $0x38] sm:$0xff] }
  0x89   : > { %613 = vmatpush.msra.mxu0 %v516_v34  ;;  %672 = vmatpush.msra.mxu3 %v565_v41  ;;  %v531_v51 = vld [vmem:[#allocation9 + $0xd0] sm:$0xff]  ;;  %v562_v53 = vld [vmem:[#allocation9 + $0x1c8] sm:$0xff]  ;;  %v545_v54 = vld [vmem:[#allocation9 + $0x140] sm:$0xff] }
  0x8a   : > { %653 = vmatpush.msra.mxu2 %v548_v42  ;;  %632 = vmatpush.msra.mxu1 %v533_v43  ;;  %v530_v55 = vld [vmem:[#allocation9 + $0xc8] sm:$0xff]  ;;  %v511_v56 = vld [vmem:[#allocation9 + $0x30] sm:$0xff]  ;;  %v561_v57 = vld [vmem:[#allocation9 + $0x1c0] sm:$0xff] }
  0x8b   : > { %614 = vmatpush.msra.mxu0 %v515_v39  ;;  %673 = vmatpush.msra.mxu3 %v564_v45  ;;  %v544_v58 = vld [vmem:[#allocation9 + $0x138] sm:$0xff]  ;;  %v529_v59 = vld [vmem:[#allocation9 + $0xc0] sm:$0xff]  ;;  %v510_v60 = vld [vmem:[#allocation9 + $0x28] sm:$0xff] }
  0x8c   : > { %654 = vmatpush.msra.mxu2 %v547_v46  ;;  %633 = vmatpush.msra.mxu1 %v532_v47  ;;  %v560_v61 = vld [vmem:[#allocation9 + $0x1b8] sm:$0xff]  ;;  %v543_v62 = vld [vmem:[#allocation9 + $0x130] sm:$0xff]  ;;  %v509_v0 = vld [vmem:[#allocation9 + $0x20] sm:$0xff] }
  0x8d   : > { %615 = vmatpush.msra.mxu0 %v514_v44  ;;  %674 = vmatpush.msra.mxu3 %v563_v49  ;;  %v528_v63 = vld [vmem:[#allocation9 + $0xb8] sm:$0xff]  ;;  %v559_v3 = vld [vmem:[#allocation9 + $0x1b0] sm:$0xff]  ;;  %v542_v4 = vld [vmem:[#allocation9 + $0x128] sm:$0xff] }
  0x8e   : > { %655 = vmatpush.msra.mxu2 %v546_v50  ;;  %634 = vmatpush.msra.mxu1 %v531_v51  ;;  %v527_v5 = vld [vmem:[#allocation9 + $0xb0] sm:$0xff]  ;;  %v508_v6 = vld [vmem:[#allocation9 + $0x18] sm:$0xff]  ;;  %v558_v7 = vld [vmem:[#allocation9 + $0x1a8] sm:$0xff] }
  0x8f   : > { %616 = vmatpush.msra.mxu0 %v513_v48  ;;  %675 = vmatpush.msra.mxu3 %v562_v53  ;;  %v541_v8 = vld [vmem:[#allocation9 + $0x120] sm:$0xff]  ;;  %v526_v9 = vld [vmem:[#allocation9 + $0xa8] sm:$0xff]  ;;  %v507_v10 = vld [vmem:[#allocation9 + $0x10] sm:$0xff] }
  0x90   : > { %656 = vmatpush.msra.mxu2 %v545_v54  ;;  %635 = vmatpush.msra.mxu1 %v530_v55  ;;  %v557_v11 = vld [vmem:[#allocation9 + $0x1a0] sm:$0xff]  ;;  %v503_v12 = vld [vmem:[#allocation3] sm:$0xff]  ;;  %v506_v13 = vld [vmem:[#allocation9 + $0x8] sm:$0xff] }
  0x91   : > { %617 = vmatpush.msra.mxu0 %v512_v52  ;;  %676 = vmatpush.msra.mxu3 %v561_v57  ;;  %v540_v14 = vld [vmem:[#allocation9 + $0x118] sm:$0xff]  ;;  %v525_v15 = vld [vmem:[#allocation9 + $0xa0] sm:$0xff]  ;;  %592 = vst [vmem:[#allocation1] ss:$4 sm:$0xff] %v503_v12  ;;  %v539_v16 = vld [vmem:[#allocation9 + $0x110] sm:$0xff] }
  0x92   : > { %657 = vmatpush.msra.mxu2 %v544_v58  ;;  %636 = vmatpush.msra.mxu1 %v529_v59  ;;  %v556_v17 = vld [vmem:[#allocation9 + $0x198] sm:$0xff]  ;;  %v505_v2 = vld [vmem:[#allocation9] sm:$0xff]  ;;  %v555_v20 = vld [vmem:[#allocation9 + $0x190] sm:$0xff] }
  0x93   : > { %618 = vmatpush.msra.mxu0 %v511_v56  ;;  %677 = vmatpush.msra.mxu3 %v560_v61  ;;  %v524_v18 = vld [vmem:[#allocation9 + $0x98] sm:$0xff]  ;;  %v538_v22 = vld [vmem:[#allocation9 + $0x108] sm:$0xff]  ;;  %v523_v23 = vld [vmem:[#allocation9 + $0x90] sm:$0xff] }
  0x94   : > { %658 = vmatpush.msra.mxu2 %v543_v62  ;;  %637 = vmatpush.msra.mxu1 %v528_v63  ;;  %v504_v19 = vld [vmem:[#allocation3 + $0x8] sm:$0xf]  ;;  %v554_v24 = vld [vmem:[#allocation9 + $0x188] sm:$0xff]  ;;  %v583_v26 = vld [vmem:[#allocation9 + $0x270] sm:$0xff] }
  0x95   : > { %619 = vmatpush.msra.mxu0 %v510_v60  ;;  %678 = vmatpush.msra.mxu3 %v559_v3  ;;  %594 = vst [vmem:[#allocation1 + $0x20] ss:$4 sm:$0xff] %v504_v19  ;;  %v584_v21 = vld [vmem:[#allocation9 + $0x278] sm:$0xff]  ;;  %v537_v27 = vld [vmem:[#allocation9 + $0x100] sm:$0xff]  ;;  %v522_v25 = vld [vmem:[#allocation9 + $0x88] sm:$0xff] }
  0x96   : > { %659 = vmatpush.msra.mxu2 %v542_v4  ;;  %638 = vmatpush.msra.mxu1 %v527_v5  ;;  %v582_v28 = vld [vmem:[#allocation9 + $0x268] sm:$0xff]  ;;  %v553_v29 = vld [vmem:[#allocation9 + $0x180] sm:$0xff]  ;;  %v580_v36 = vld [vmem:[#allocation9 + $0x258] sm:$0xff] }
  0x97   : > { %620 = vmatpush.msra.mxu0 %v509_v0  ;;  %679 = vmatpush.msra.mxu3 %v558_v7  ;;  %v581_v32 = vld [vmem:[#allocation9 + $0x260] sm:$0xff]  ;;  %v744_v38 = vld [vmem:[#allocation10 + $0x70] sm:$0xff]  ;;  %v579_v39 = vld [vmem:[#allocation9 + $0x250] sm:$0xff] }
  0x98   : > { %660 = vmatpush.msra.mxu2 %v541_v8  ;;  %639 = vmatpush.msra.mxu1 %v526_v9  ;;  %v597_v1 = vld.sshfl [vmem:[#allocation1 + $0x10] sm:$0xff pattern:$0x73625140]  ;;  %v595_v30 = vld.sshfl [vmem:[#allocation1] sm:$0xff pattern:$0x73625140] }
  0x99   : > { %621 = vmatpush.msra.mxu0 %v508_v6  ;;  %680 = vmatpush.msra.mxu3 %v557_v11  ;;  %v598_v31 = vld.sshfl [vmem:[#allocation1 + $0x18] sm:$0xff pattern:$0x73625140]  ;;  %v521_v33 = vld [vmem:[#allocation9 + $0x80] sm:$0xff]  ;;  %v578_v41 = vld [vmem:[#allocation9 + $0x248] sm:$0xff] }
  0x9a   : > { %661 = vmatpush.msra.mxu2 %v540_v14  ;;  %640 = vmatpush.msra.mxu1 %v525_v15  ;;  %v596_v34 = vld.sshfl [vmem:[#allocation1 + $0x8] sm:$0xff pattern:$0x73625140]  ;;  %v743_v40 = vld [vmem:[#allocation10 + $0x68] sm:$0xff]  ;;  %v576_v46 = vld [vmem:[#allocation9 + $0x238] sm:$0xff] }
  0x9b   : > { %622 = vmatpush.msra.mxu0 %v507_v10  ;;  %681 = vmatpush.msra.mxu3 %v556_v17  ;;  %v745_v35 = vld [vmem:[#allocation10 + $0x78] sm:$0xff]  ;;  %v742_v42 = vld [vmem:[#allocation10 + $0x60] sm:$0xff]  ;;  %v740_v47 = vld [vmem:[#allocation10 + $0x50] sm:$0xff] }
  0x9c   : > { %662 = vmatpush.msra.mxu2 %v539_v16  ;;  %641 = vmatpush.msra.mxu1 %v524_v18  ;;  %v585_v37 = vld [vmem:[#allocation9 + $0x280] sm:$0xff]  ;;  %v575_v48 = vld [vmem:[#allocation9 + $0x230] sm:$0xff]  ;;  %v574_v50 = vld [vmem:[#allocation9 + $0x228] sm:$0xff] }
  0x9d   : > { %623 = vmatpush.msra.mxu0 %v506_v13  ;;  %682 = vmatpush.msra.mxu3 %v555_v20  ;;  %v577_v43 = vld [vmem:[#allocation9 + $0x240] sm:$0xff]  ;;  %v739_v49 = vld [vmem:[#allocation10 + $0x48] sm:$0xff]  ;;  %v738_v51 = vld [vmem:[#allocation10 + $0x40] sm:$0xff] }
  0x9e   : > { %663 = vmatpush.msra.mxu2 %v538_v22  ;;  %642 = vmatpush.msra.mxu1 %v523_v23  ;;  %v600_v44 = vld.sshfl [vmem:[#allocation1 + $0x28] sm:$0xff pattern:$0x73625140]  ;;  %v572_v53 = vld [vmem:[#allocation9 + $0x218] sm:$0xff]  ;;  %v571_v54 = vld [vmem:[#allocation9 + $0x210] sm:$0xff] }
  0x9f   : > { %624 = vmatpush.msra.mxu0 %v505_v2  ;;  %683 = vmatpush.msra.mxu3 %v554_v24  ;;  %v741_v45 = vld [vmem:[#allocation10 + $0x58] sm:$0xff]  ;;  %v570_v55 = vld [vmem:[#allocation9 + $0x208] sm:$0xff]  ;;  %v736_v59 = vld [vmem:[#allocation10 + $0x30] sm:$0xff] }
  0xa0   : > { %664 = vmatpush.msra.mxu2 %v537_v27  ;;  %643 = vmatpush.msra.mxu1 %v522_v25  ;;  %v573_v52 = vld [vmem:[#allocation9 + $0x220] sm:$0xff]  ;;  %v735_v60 = vld [vmem:[#allocation10 + $0x28] sm:$0xff]  ;;  %v734_v61 = vld [vmem:[#allocation10 + $0x20] sm:$0xff] }
  0xa1   : > { %689 = vmatpush.msrb.mxu0 %v584_v21  ;;  %665 = vmatmul.f32.vlgmr.msra.gmra.mxu2 %v597_v1  ;;  %v569_v56 = vld [vmem:[#allocation9 + $0x200] sm:$0xff]  ;;  %v732_v63 = vld [vmem:[#allocation10 + $0x10] sm:$0xff]  ;;  %v731_v0 = vld [vmem:[#allocation10 + $0x8] sm:$0xff] }
  0xa2   : > { %684 = vmatpush.msra.mxu3 %v553_v29  ;;  %625 = vmatmul.f32.vlgmr.msra.gmra.mxu0 %v595_v30  ;;  %v599_v57 = vld.sshfl [vmem:[#allocation1 + $0x20] sm:$0xff pattern:$0x73625140]  ;;  %v730_v3 = vld [vmem:[#allocation10] sm:$0xff] }
  0xa3   : > { %690 = vmatpush.msrb.mxu0 %v583_v26  ;;  %685 = vmatmul.f32.vlgmr.msra.gmra.mxu3 %v598_v31  ;;  %v737_v58 = vld [vmem:[#allocation10 + $0x38] sm:$0xff]  ;;  %v1000_v4 = vld [vmem:[%s1503_s3] ss:$0 sm:$0xff] }
  0xa4   : > { %644 = vmatpush.msra.mxu1 %v521_v33  ;;  %750 = vmatpush.msrb.mxu2 %v745_v35  ;;  %v733_v62 = vld [vmem:[#allocation10 + $0x18] sm:$0xff]  ;;  %v1001_v18 = vld [vmem:[%s1505_s5] ss:$0 sm:$0xff] }
  0xa5   : > { %691 = vmatpush.msrb.mxu0 %v582_v28  ;;  %645 = vmatmul.f32.vlgmr.msra.gmra.mxu1 %v596_v34 }
  0xa6   : > { %724 = vmatpush.msrb.mxu1 %v585_v37  ;;  %751 = vmatpush.msrb.mxu2 %v744_v38 }
  0xa7   : > { %692 = vmatpush.msrb.mxu0 %v581_v32 }
  0xa8   : > { %752 = vmatpush.msrb.mxu2 %v743_v40 }
  0xa9   : > { %693 = vmatpush.msrb.mxu0 %v580_v36 }
  0xaa   : > { %753 = vmatpush.msrb.mxu2 %v742_v42 }
  0xab   : > { %694 = vmatpush.msrb.mxu0 %v579_v39 }
  0xac   : > { %754 = vmatpush.msrb.mxu2 %v741_v45 }
  0xad   : > { %695 = vmatpush.msrb.mxu0 %v578_v41  ;;  %893 = vmatmul.msk.f32.vlgmr.msrb.gmra.mxu1 %vm606_vm7, %v600_v44 }
  0xae   : > { %755 = vmatpush.msrb.mxu2 %v740_v47 }
  0xaf   : > { %696 = vmatpush.msrb.mxu0 %v577_v43 }
  0xb0   : > { %756 = vmatpush.msrb.mxu2 %v739_v49 }
  0xb1   : > { %697 = vmatpush.msrb.mxu0 %v576_v46 }
  0xb2   : > { %757 = vmatpush.msrb.mxu2 %v738_v51 }
  0xb3   : > { %698 = vmatpush.msrb.mxu0 %v575_v48 }
  0xb4   : > { %758 = vmatpush.msrb.mxu2 %v737_v58 }
  0xb5   : > { %699 = vmatpush.msrb.mxu0 %v574_v50 }
  0xb6   : > { %759 = vmatpush.msrb.mxu2 %v736_v59 }
  0xb7   : > { %700 = vmatpush.msrb.mxu0 %v573_v52 }
  0xb8   : > { %760 = vmatpush.msrb.mxu2 %v735_v60 }
  0xb9   : > { %701 = vmatpush.msrb.mxu0 %v572_v53 }
  0xba   : > { %761 = vmatpush.msrb.mxu2 %v734_v61 }
  0xbb   : > { %702 = vmatpush.msrb.mxu0 %v571_v54 }
  0xbc   : > { %762 = vmatpush.msrb.mxu2 %v733_v62 }
  0xbd   : > { %703 = vmatpush.msrb.mxu0 %v570_v55 }
  0xbe   : > { %763 = vmatpush.msrb.mxu2 %v732_v63 }
  0xbf   : > { %704 = vmatpush.msrb.mxu0 %v569_v56 }
  0xc0   : > { %705 = vmatmul.f32.vlgmr.msrb.gmra.mxu0 %v599_v57  ;;  %764 = vmatpush.msrb.mxu2 %v731_v0 }
  0xc2   : > { %765 = vmatpush.msrb.mxu2 %v730_v3 }
 0x11f   : > { %v626_v5 = vpop.f32.mrf.mxu0 }
 0x120   : > { %v627_v6 = vadd.f32 %v1000_v4, %v626_v5 }
 0x122   : > { %v646_v7 = vpop.f32.mrf.mxu1 }
 0x123   : > { %v647_v8 = vadd.f32 %v646_v7, %v627_v6 }
 0x124   : > { %v666_v9 = vpop.f32.mrf.mxu2 }
 0x125   : > { %v667_v10 = vadd.f32 %v666_v9, %v647_v8 }
 0x126   : > { %v686_v11 = vpop.f32.mrf.mxu3 }
 0x127   : > { %v687_v12 = vadd.f32 %v686_v11, %v667_v10 }
 0x12a   : > { %v726_v14 = vpop.f32.mrf.mxu1 }
 0x13d   : > { %v706_v13 = vpop.f32.mrf.mxu0 }
 0x13e   : > { %v707_v15 = vadd.f32 %v706_v13, %v687_v12 }
 0x140   : > { %v727_v16 = vadd.f32 %v726_v14, %v707_v15 }
 0x142   : > { %v729_v17 = vmax.f32 %v727_v16, 0.0 }
 0x144   : > { %766 = vmatmul.f32.vlgmr.msrb.gmra.mxu2 %v729_v17 }
 0x1c7   : > { %v767_v19 = vpop.f32.mrf.mxu2 }
 0x1c8   : > { %v768_v2 = vadd.f32 %v1001_v18, %v767_v19 }
 0x1ca   : > { %770 = vst [vmem:[#allocation12] sm:$0x3] %v768_v2 }
 0x1cb PF: > { %p940_p4 = scmp.eq.s32.totalorder %s1292_s27, 8  ;;  %s781_s21 = sshll.u32 %s1506_s6, 4  ;;  %s782_s21 = int_to_ptr.hbm [resolvable:$true] %s781_s21 }
 0x1cc   : > { %s1227_s7 = smov [#allocation12]  }
 0x1cd   : > { %s779_s18 = sshll.u32 %s1227_s7, 4  ;;  %s780_s18 = int_to_ptr.vmem [resolvable:$true] %s779_s18 }
 0x1ce   : > { %916 = dma.vmem_to_hbm [thread:$0]  (%p940_p4), %s780_s18, 32, %s782_s21, [#allocation6]  }
 0x1cf   : > { %1191 = dma.done.wait (%p940_p4), [#allocation6], 32  }
 0x1d0   : > { %1193 = vsyncadd (%p940_p4), [#allocation6], 4294967264 }
 0x1d1 PF: > { %s22_s26 = sadd.s32 1, %s1216_s26   ;;  %s1520_s21 = smov %s1200_s22 }
 0x1d2   : > { %p19_p5 = scmp.ge.s32.totalorder %s22_s26, 11   ;;  %s1521_s22 = smov %s1204_s23 }
 0x1d3   : > { %s1522_s23 = smov %s1358_s12  ;;  %s1523_s24 = smov %s1212_s25 }
 0x1d4   : > { %s1524_s25 = smov %s1526_s10  ;;  %21 = sbr.rel (!%p19_p5) target bundleno = 11 (0xb), region = 112 }
 0x1d9   :  { %795 = vsyncpa [#allocation5], 1 }
 0x1da   :  { %797 = vsyncpa [#allocation5 + $0x1], 1 }
 0x1db   :  { %798 = vsyncpa [#allocation8], 1 }
 0x1dc   :  { %800 = vsyncpa [#allocation8 + $0x1], 1 }
 0x1dd   :  { %801 = vsyncpa [#allocation11], 1 }
 0x1de   :  { %802 = vsyncpa [#allocation6], 1 }
 0x1df   :  { %804 = vsyncpa [#allocation6 + $0x1], 1 }

</bundles_post_ra>
